<compile_context>
chip_gen: v6e
topology: v6e:2x2x1
jax: 0.10.0
libtpu: 0.0.40
codegen_flags: <defaults>
</compile_context>

<pallas_src>
import jax
import jax.numpy as jnp
from jax.experimental import pallas as pl
from jax.experimental.pallas import tpu as pltpu


def _downsample2_kernel(x_ref, wl_ref, p_ref, o_ref):
    # x_ref : (1, C_in, 2*th, W)        raw NCHW rows for this tile
    # wl_ref: (C_out*th, C_in*2*th) bf16  kron(conv_w, row-pair matrix)
    # p_ref : (W, Wo) bf16                column-pair pooling matrix (0.25-scaled)
    # o_ref : (1, C_out, th, Wo) f32      NCHW output tile
    c_in = x_ref.shape[1]
    rows2 = x_ref.shape[2]          # 2*th
    w_in = x_ref.shape[3]
    c_out = o_ref.shape[1]
    th = o_ref.shape[2]
    w_out = o_ref.shape[3]

    # Merge (C_in, 2*th) -> sublanes; W stays on lanes (free for th % 8 == 0).
    xb = x_ref[0].reshape(c_in * rows2, w_in).astype(jnp.bfloat16)

    # 1x1 conv + vertical 2-tap sum in one MXU matmul (lanes = W).
    tmp = jnp.dot(wl_ref[...], xb, preferred_element_type=jnp.float32)

    # Horizontal 2-tap sum + the 1/4 of the 2x2 mean (lanes = Wo, lane-dense store).
    out = jnp.dot(tmp.astype(jnp.bfloat16), p_ref[...],
                  preferred_element_type=jnp.float32)

    o_ref[0] = out.reshape(c_out, th, w_out).astype(o_ref.dtype)


def _pick_rows_per_block(h_out: int) -> int:
    for cand in (32, 16, 8):
        if h_out % cand == 0:
            return cand
    return h_out  # tiny / irregular row counts: single block of all rows


def downsample_2(x_nchw, conv_weight):
    """x_nchw: (N, C_in, H, W) f32; conv_weight: (C_out, C_in, 1, 1) f32."""
    n, c_in, h, w = x_nchw.shape
    c_out = conv_weight.shape[0]
    h_out, w_out = h // 2, w // 2
    # bilinear x0.5 (align_corners=False) never samples an odd trailing row/col.
    # TODO(synk): only scale_factor=0.5 is covered; other bilinear scales need a real resampler.
    x = x_nchw[:, :, : 2 * h_out, : 2 * w_out]
    w_in = 2 * w_out

    th = _pick_rows_per_block(h_out)

    # Left matrix: conv weight expanded with the vertical 2-tap pairing per block row.
    w2d = conv_weight[:, :, 0, 0].astype(jnp.float32)                       # (C_out, C_in)
    row_pairs = jnp.kron(jnp.eye(th, dtype=jnp.float32),
                         jnp.ones((1, 2), jnp.float32))                     # (th, 2*th)
    w_left = jnp.kron(w2d, row_pairs).astype(jnp.bfloat16)                  # (C_out*th, C_in*2*th)

    # Right matrix: horizontal 2-tap pairing + the 1/4 of the 2x2 mean folded in.
    col_pairs = jnp.kron(jnp.eye(w_out, dtype=jnp.float32),
                         jnp.ones((2, 1), jnp.float32))                     # (W, Wo)
    p_right = (0.25 * col_pairs).astype(jnp.bfloat16)

    grid = (n, h_out // th)
    out = pl.pallas_call(
        _downsample2_kernel,
        out_shape=jax.ShapeDtypeStruct((n, c_out, h_out, w_out), jnp.float32),
        grid_spec=pltpu.PrefetchScalarGridSpec(
            num_scalar_prefetch=0,
            grid=grid,
            in_specs=[
                # Bump to pipeline_mode=pl.Buffered(3) if DMA is still exposed after tiling.
                pl.BlockSpec((1, c_in, 2 * th, w_in), lambda b, t: (b, 0, t, 0)),
                pl.BlockSpec((c_out * th, c_in * 2 * th), lambda b, t: (0, 0)),
                pl.BlockSpec((w_in, w_out), lambda b, t: (0, 0)),
            ],
            out_specs=pl.BlockSpec((1, c_out, th, w_out), lambda b, t: (b, 0, t, 0)),
        ),
        compiler_params=pltpu.CompilerParams(
            dimension_semantics=("parallel", "parallel"),
            vmem_limit_bytes=48 * 1024 * 1024,
        ),
    )(x, w_left, p_right)

    return out  # already NCHW


if __name__ == "__main__":
    key = jax.random.PRNGKey(0)
    kx, kw = jax.random.split(key)

    # Small shapes consistent with the module: batch=2, in_ch=4, out_ch=8, 16x16 spatial.
    N, C_in, C_out, H, W = 2, 4, 8, 16, 16
    x = jax.random.normal(kx, (N, C_in, H, W), dtype=jnp.float32)
    conv_w = 0.1 * jax.random.normal(kw, (C_out, C_in, 1, 1), dtype=jnp.float32)

    y = downsample_2(x, conv_w)
    y = jax.block_until_ready(y)

    # Pure-JAX f32 reference: 2x2 average pool + 1x1 conv.
    pooled = 0.25 * (x[:, :, 0::2, 0::2] + x[:, :, 0::2, 1::2]
                     + x[:, :, 1::2, 0::2] + x[:, :, 1::2, 1::2])
    ref = jnp.einsum('nchw,oc->nohw', pooled, conv_w[:, :, 0, 0])

    assert y.shape == (N, C_out, H // 2, W // 2), y.shape
    # bf16 MXU operands with f32 accumulation -> loosened (but still tight) tolerance.
    assert jnp.allclose(y, ref, rtol=5e-2, atol=1e-2), float(jnp.max(jnp.abs(y - ref)))
    print("KERNEL_OK")
</pallas_src>

<mosaic_0001>
module attributes {stable_mosaic.version = 11 : i64} {
  func.func @_downsample2_kernel(%arg0: i32, %arg1: i32, %arg2: memref<1x4x16x16xf32, #tpu.memory_space<vmem>>, %arg3: memref<64x64xbf16, #tpu.memory_space<vmem>>, %arg4: memref<16x8xbf16, #tpu.memory_space<vmem>>, %arg5: memref<1x8x8x8xf32, #tpu.memory_space<vmem>>) attributes {dimension_semantics = [#tpu.dimension_semantics<parallel>, #tpu.dimension_semantics<parallel>], iteration_bounds = array<i64: 2, 1>, scalar_prefetch = 0 : i64, scratch_operands = 0 : i64, tpu.core_type = #tpu.core_type<tc>, window_params = [{transform_indices = @transform_0, window_bounds = array<i64: 1, 4, 16, 16>}, {pipeline_mode = #tpu.pipeline_mode<synchronous>, transform_indices = @transform_1, window_bounds = array<i64: 64, 64>}, {pipeline_mode = #tpu.pipeline_mode<synchronous>, transform_indices = @transform_2, window_bounds = array<i64: 16, 8>}, {transform_indices = @transform_3, window_bounds = array<i64: 1, 8, 8, 8>}]} {
    %c0 = arith.constant 0 : index
    %c0_0 = arith.constant 0 : index
    %c0_1 = arith.constant 0 : index
    %c0_2 = arith.constant 0 : index
    %0 = vector.load %arg2[%c0, %c0_0, %c0_1, %c0_2] : memref<1x4x16x16xf32, #tpu.memory_space<vmem>>, vector<1x4x16x16xf32>
    %1 = vector.shape_cast %0 : vector<1x4x16x16xf32> to vector<4x16x16xf32>
    %2 = vector.shape_cast %1 : vector<4x16x16xf32> to vector<64x16xf32>
    %3 = arith.truncf %2 : vector<64x16xf32> to vector<64x16xbf16>
    %c0_3 = arith.constant 0 : index
    %c0_4 = arith.constant 0 : index
    %4 = vector.load %arg3[%c0_3, %c0_4] : memref<64x64xbf16, #tpu.memory_space<vmem>>, vector<64x64xbf16>
    %cst = arith.constant dense<0.000000e+00> : vector<64x16xf32>
    %5 = tpu.matmul %4, %3, %cst {dimension_numbers = #tpu.dot_dimension_numbers<[1], [0], [0], [1], [0, 0, 1, 1], [], []>} : vector<64x64xbf16>, vector<64x16xbf16>, vector<64x16xf32> -> vector<64x16xf32>
    %6 = arith.truncf %5 : vector<64x16xf32> to vector<64x16xbf16>
    %c0_5 = arith.constant 0 : index
    %c0_6 = arith.constant 0 : index
    %7 = vector.load %arg4[%c0_5, %c0_6] : memref<16x8xbf16, #tpu.memory_space<vmem>>, vector<16x8xbf16>
    %cst_7 = arith.constant dense<0.000000e+00> : vector<64x8xf32>
    %8 = tpu.matmul %6, %7, %cst_7 {dimension_numbers = #tpu.dot_dimension_numbers<[1], [0], [0], [1], [0, 0, 1, 1], [], []>} : vector<64x16xbf16>, vector<16x8xbf16>, vector<64x8xf32> -> vector<64x8xf32>
    %9 = vector.shape_cast %8 : vector<64x8xf32> to vector<8x8x8xf32>
    %c0_8 = arith.constant 0 : index
    %c0_9 = arith.constant 0 : index
    %c0_10 = arith.constant 0 : index
    %c0_11 = arith.constant 0 : index
    %10 = vector.load %arg5[%c0_8, %c0_9, %c0_10, %c0_11] : memref<1x8x8x8xf32, #tpu.memory_space<vmem>>, vector<1x8x8x8xf32>
    %11 = vector.shape_cast %10 : vector<1x8x8x8xf32> to vector<8x8x8xf32>
    %12 = vector.shape_cast %9 : vector<8x8x8xf32> to vector<1x8x8x8xf32>
    tpu.vector_store %arg5[%c0_8, %c0_9, %c0_10, %c0_11], %12 {strides = array<i32>} : memref<1x8x8x8xf32, #tpu.memory_space<vmem>>, vector<1x8x8x8xf32>,
    return
  }
  func.func @transform_0(%arg0: i32, %arg1: i32) -> (i32, i32, i32, i32) {
    %c0_i32 = arith.constant 0 : i32
    %c0_i32_0 = arith.constant 0 : i32
    %c0_i32_1 = arith.constant 0 : i32
    return %arg0, %c0_i32, %arg1, %c0_i32_0 : i32, i32, i32, i32
  }
  func.func @transform_1(%arg0: i32, %arg1: i32) -> (i32, i32) {
    %c0_i32 = arith.constant 0 : i32
    %c0_i32_0 = arith.constant 0 : i32
    %c0_i32_1 = arith.constant 0 : i32
    return %c0_i32, %c0_i32_0 : i32, i32
  }
  func.func @transform_2(%arg0: i32, %arg1: i32) -> (i32, i32) {
    %c0_i32 = arith.constant 0 : i32
    %c0_i32_0 = arith.constant 0 : i32
    %c0_i32_1 = arith.constant 0 : i32
    return %c0_i32, %c0_i32_0 : i32, i32
  }
  func.func @transform_3(%arg0: i32, %arg1: i32) -> (i32, i32, i32, i32) {
    %c0_i32 = arith.constant 0 : i32
    %c0_i32_0 = arith.constant 0 : i32
    %c0_i32_1 = arith.constant 0 : i32
    return %arg0, %c0_i32, %arg1, %c0_i32_0 : i32, i32, i32, i32
  }
}

</mosaic_0001>

<bundles_post_ra>
// kernel: tpu_custom_call.1
= control target key start
LH: loop header
LB: loop body
LE: loop exit
PB: predicated region body
PF: predicated region fallthrough
CT: control target
= control target key end

     0   :  { %8 = vsyncpa [#allocation3], 0  ;;  %s1076_s0 = inlined_call_operand.hbm [shape: f32[2,4,16,16], index: 0, kind: input, shape index: {}]   ;;  %s1077_s1 = inlined_call_operand.hbm [shape: bf16[64,64], index: 1, kind: input, shape index: {}]   ;;  %s1078_s2 = inlined_call_operand.vmem [shape: bf16[16,8], index: 2, kind: input, shape index: {}]   ;;  %s1079_s3 = inlined_call_operand.hbm [shape: f32[2,8,8,8], index: 3, kind: output, shape index: {}]  }
   0x1   :  { %10 = vsyncpa [#allocation3 + $0x1], 0 }
   0x2   :  { %11 = vsyncpa [#allocation6], 0 }
   0x3   :  { %12 = vsyncpa [#allocation4], 0 }
   0x4   :  { %14 = vsyncpa [#allocation4 + $0x1], 0  ;;  %s876_s12 = smov 0   ;;  %s878_s13 = smov 0  }
   0x5   :  { %s880_s14 = smov 0   ;;  %s882_s15 = smov 0  }
   0x6   :  { %s884_s16 = smov 0   ;;  %s886_s17 = smov 0  }
   0x7 LB: > { %s552_s18 = sadd.s32 4294967295, %s845_s17   ;;  %s553_s19 = sadd.s32 4294967294, %s845_s17   ;;  %s845_s17 = sphi %s886_s17, %s20_s17   ;;  %s841_s16 = sphi %s884_s16, %s1097_s16   ;;  %s837_s15 = sphi %s882_s15, %s1096_s15   ;;  %s833_s14 = sphi %s880_s14, %s1095_s14   ;;  %s829_s13 = sphi %s878_s13, %s1094_s13   ;;  %s825_s12 = sphi %s876_s12, %s1093_s12  }
   0x8   : > { %p54_p0 = scmp.ne.s32.totalorder %s829_s13, %s825_s12  ;;  %p910_p1 = scmp.eq.s32.totalorder %s552_s18, 0 }
   0x9   : > { %p914_p2 = scmp.eq.s32.totalorder %s552_s18, 1  ;;  %p128_p3 = scmp.eq.s32.totalorder %s553_s19, 1 }
   0xa   : > { %p920_p4 = por %p910_p1, %p54_p0  ;;  %p554_p5 = scmp.ge.s32.totalorder %s845_s17, 1 }
   0xb   : > { %p925_p6 = por %p128_p3, %p54_p0  ;;  %p135_p7 = scmp.lt.s32.totalorder %s845_s17, 3 }
   0xc   : > { %s1083_s22 = scalar_select %p920_p4, 1, 0 }
   0xd   : > { %s1084_s23 = scalar_select %p925_p6, 1, 0 }
   0xe   : > { %p930_p8 = pnand %p554_p5, %p135_p7  ;;  %s847_s25 = smov [#allocation5]  }
   0xf   : > { %s147_s26 = sshll.u32 %s847_s25, 4  ;;  %s32_s28 = sadd.s32 1, %s841_s16  ;;  %s148_s26 = int_to_ptr.vmem [resolvable:$true] %s147_s26 }
  0x10   : > { %p631_p9 = pneg %p930_p8  ;;  %s718_s29 = scalar_lea.vmem %s148_s26, 512 }
  0x11   : > { %p719_p13 = scmp.ne.s32.totalorder %s148_s26, %s718_s29  ;;  %p726_p5 = scmp.lt.s32.totalorder %s148_s26, %s148_s26 }
  0x12   : > { %p939_p11 = pnand %p631_p9, %p910_p1  ;;  %p727_p7 = scmp.lt.s32.totalorder %s718_s29, %s718_s29 }
  0x14   : > { %p709_p12 = pneg %p939_p11  ;;  %p728_p6 = por %p727_p7, %p726_p5 }
  0x16   : > { %p721_p0 = pnand %p719_p13, %p709_p12 }
  0x18   : > { %p722_p3 = pneg %p721_p0 }
  0x1a   : > { %p729_p4 = pnand %p728_p6, %p722_p3 }
  0x1c   : > { %732 = shalt.err (!%p729_p4)
}
  0x1d   : > { %s848_s30 = smov 64   ;;  %s849_s4 = smov 4  }
  0x1e   : > { %634 = dma.hbm_to_vmem [thread:$0]  (!%p939_p11), %s1077_s1, 512, %s148_s26, [#allocation6], %s848_s30, %s848_s30, %s849_s4  }
  0x1f   : > { %p34_p6 = scmp.ge.s32.totalorder %s32_s28, 2  ;;  %s41_s7 = sadd.s32 1, %s833_s14 }
  0x20   : > { %p48_p4 = scmp.ne.s32.totalorder %s833_s14, %s829_s13  ;;  %p49_p9 = scmp.eq.s32.totalorder %s845_s17, 0 }
  0x21   : > { %s1099_s28 = smov (%p34_p6, %s32_s28), 0  ;;  %p644_p0 = scmp.lt.s32.totalorder %s845_s17, 2 }
  0x22   : > { %p957_p12 = por %p49_p9, %p48_p4  ;;  %p963_p13 = por %p914_p2, %p48_p4 }
  0x23   : > { %s36_s10 = ssub.s32 %s841_s16, %s1099_s28  ;;  %s164_s11 = sand.u32 1, %s833_s14  }
  0x24   : > { %p39_p11 = scmp.eq.s32.totalorder %s36_s10, 0  ;;  %s557_s18 = sshll.u32 %s164_s11, 6 }
  0x25   : > { %s582_s25 = sshll.u32 %s841_s16, 10  ;;  %s168_s30 = scalar_lea.vmem [#allocation2], %s557_s18 }
  0x26   : > { %s972_s19 = scalar_select %p39_p11, %s833_s14, %s41_s7  }
  0x27   : > { %s176_s29 = scalar_lea.hbm %s1076_s0, %s582_s25  ;;  %s177_s4 = sshll.u32 %s168_s30, 4  ;;  %s178_s4 = int_to_ptr.vmem [resolvable:$true] %s177_s4 }
  0x28   : > { %p980_p2 = pnand %p644_p0, %p957_p12  ;;  %s165_s5 = scalar_lea.sflag [#allocation3], %s164_s11 }
  0x29   : > { %s746_s6 = scalar_lea.vmem %s178_s4, 1024  ;;  %s850_s7 = smov [#allocation2]  }
  0x2a   : > { %p735_p3 = pneg %p980_p2  ;;  %p747_p5 = scmp.ne.s32.totalorder %s178_s4, %s746_s6 }
  0x2b   : > { %s751_s10 = sshll.u32 %s850_s7, 4  ;;  %s752_s10 = int_to_ptr.vmem [resolvable:$false] %s751_s10 }
  0x2c   : > { %p749_p7 = pnand %p747_p5, %p735_p3  ;;  %s753_s25 = scalar_lea.vmem %s752_s10, 2048 }
  0x2d   : > { %p754_p4 = scmp.lt.s32.totalorder %s178_s4, %s752_s10  ;;  %p755_p9 = scmp.lt.s32.totalorder %s753_s25, %s746_s6 }
  0x2e   : > { %p750_p6 = pneg %p749_p7 }
  0x2f   : > { %p756_p11 = por %p755_p9, %p754_p4 }
  0x31   : > { %p757_p10 = pnand %p756_p11, %p750_p6 }
  0x33   : > { %760 = shalt.err (!%p757_p10)
}
  0x34   : > { %s851_s8 = smov 128   ;;  %s852_s18 = smov 8  }
  0x35   : > { %638 = dma.hbm_to_vmem [thread:$0]  (!%p980_p2), %s176_s29, 1024, %s178_s4, %s165_s5, %s851_s8, %s851_s8, %s852_s18  }
  0x36   : > { %189 = sbr.rel (%p930_p8) target bundleno = 504 (0x1f8), region = 32  ;;  %s991_s11 = sand.u32 (!%p930_p8), 1, %s829_s13  }
  0x37   : > { %s561_s26 = sshll.u32 (!%p930_p8), %s991_s11, 6  ;;  %s192_s27 = scalar_lea.sflag (!%p930_p8), [#allocation3], %s991_s11 }
  0x38   : > { %s195_s30 = scalar_lea.vmem (!%p930_p8), [#allocation2], %s561_s26  ;;  %p1090_p10 = scmp.ne.s32.totalorder (!%p930_p8), %s1083_s22, 0 }
  0x3b   : > { %812 = dma.done.wait (%p1090_p10), %s192_s27, 1024  }
  0x3c   : > { %814 = vsyncadd (%p1090_p10), %s192_s27, 4294966272 }
  0x3d   : > { %816 = dma.done.wait (%p910_p1), [#allocation6], 512  }
  0x3e   : > { %818 = vsyncadd (%p910_p1), [#allocation6], 4294966784  ;;  %v230_v0 = vld [vmem:[%s195_s30 + $0x30] sm:$0xff]  ;;  %v231_v1 = vld [vmem:[%s195_s30 + $0x38] sm:$0xff]  ;;  %vm264_vm0 = vcmask 523264   ;;  %vm354_vm1 = vcmask 130048  }
  0x3f   : > { %v228_v2 = vld [vmem:[%s195_s30 + $0x20] sm:$0xff]  ;;  %v235_v3 = vpack.c.bf16 %v231_v1, %v230_v0  ;;  %v229_v4 = vld [vmem:[%s195_s30 + $0x28] sm:$0xff]  ;;  %v226_v6 = vld [vmem:[%s195_s30 + $0x10] sm:$0xff]  ;;  %vm432_vm2 = vcmask 64512   ;;  %s221_s24 = scalar_lea.vmem [#allocation7], %s561_s26  ;;  %s583_s4 = sshll.u32 %s837_s15, 10 }
  0x40   : > { %v234_v5 = vpack.c.bf16 %v229_v4, %v228_v2  ;;  %v227_v7 = vld [vmem:[%s195_s30 + $0x18] sm:$0xff]  ;;  %v702_v8 = vld [vmem:[#allocation5] sm:$0xff]   ;;  %v225_v11 = vld [vmem:[%s195_s30 + $0x8] sm:$0xff]  ;;  %s456_s29 = sshll.u32 %s221_s24, 4  ;;  %s1026_s6 = scalar_lea.hbm %s1079_s3, %s583_s4  ;;  %s1020_s29 = int_to_ptr.vmem [resolvable:$true] %s456_s29 }
  0x41   : > { %597 = vmatprep.subr.bf16.mxu0 %v235_v3  ;;  %v233_v9 = vpack.c.bf16 %v227_v7, %v226_v6  ;;  %v224_v10 = vld [vmem:[%s195_s30] sm:$0xff]  ;;  %605 = vmatprep.mubr.msk.bf16.mxu0 %vm264_vm0, %v702_v8  ;;  %v703_v13 = vld [vmem:[#allocation5 + $0x8] sm:$0xff]   ;;  %v704_v14 = vld [vmem:[#allocation5 + $0x10] sm:$0xff]   ;;  %s442_s15 = scalar_lea.sflag [#allocation4], %s991_s11  ;;  %s761_s7 = scalar_lea.vmem %s1020_s29, 1024 }
  0x42   : > { %598 = vmatpush3.bf16.msra.mxu0 %v235_v3  ;;  %v232_v12 = vpack.c.bf16 %v225_v11, %v224_v10  ;;  %v705_v15 = vld [vmem:[#allocation5 + $0x18] sm:$0xff]   ;;  %v706_v16 = vld [vmem:[%s1078_s2] sm:$0xff]   ;;  %p762_p1 = scmp.ne.s32.totalorder %s1020_s29, %s761_s7  ;;  %s853_s10 = smov [#allocation7]  }
  0x43   : > { %599 = vmatprep.subr.bf16.mxu0 %v234_v5  ;;  %613 = vmatprep.subr.bf16.mxu1 %v706_v16  ;;  %s765_s25 = sshll.u32 %s853_s10, 4  ;;  %s766_s25 = int_to_ptr.vmem [resolvable:$false] %s765_s25 }
  0x44   : > { %614 = vmatpush3.bf16.msra.mxu1 %v706_v16  ;;  %p763_p8 = pnand %p762_p1, %p963_p13  ;;  %s767_s8 = scalar_lea.vmem %s766_s25, 2048 }
  0x45   : > { %p768_p0 = scmp.lt.s32.totalorder %s1020_s29, %s766_s25  ;;  %p769_p2 = scmp.lt.s32.totalorder %s767_s8, %s761_s7 }
  0x46   : > { %600 = vmatpush3.bf16.msra.mxu0 %v234_v5  ;;  %p764_p12 = pneg %p763_p8 }
  0x47   : > { %601 = vmatprep.subr.bf16.mxu0 %v233_v9  ;;  %p770_p3 = por %p769_p2, %p768_p0 }
  0x49   : > { %p771_p5 = pnand %p770_p3, %p764_p12 }
  0x4a   : > { %602 = vmatpush3.bf16.msra.mxu0 %v233_v9 }
  0x4b   : > { %603 = vmatprep.subr.bf16.mxu0 %v232_v12 }
  0x4e   : > { %604 = vmatpush3.bf16.msra.mxu0 %v232_v12 }
  0x51   : > { %606 = vmatmul.mubr.msk.bf16.vlgmr.msra.gmra.mxu0 %vm264_vm0, %v703_v13 }
  0x52   : > { %609 = vmatprep.mubr.msk.bf16.mxu0 %vm264_vm0, %v704_v14 }
  0x59   : > { %610 = vmatmul.mubr.msk.bf16.gmra.mxu0 %vm264_vm0, %v705_v15 }
 0x111   : > { %v607_v17 = vpop.f32.mrf.mxu0 }
 0x113   : > { %v311_v18 = vpop.f32.mrf.mxu0 }
 0x115   : > { %v608_v19 = vpop.f32.mrf.mxu0 }
 0x116   : > { %v343_v22 = vpack.c.bf16 %v608_v19, %v607_v17 }
 0x117   : > { %v314_v20 = vpop.f32.mrf.mxu0 }
 0x118   : > { %v342_v21 = vpack.c.bf16 %v314_v20, %v311_v18 }
 0x119   : > { %v611_v23 = vpop.f32.mrf.mxu0 }
 0x11a   : > { %615 = vmatprep.mubr.msk.bf16.mxu1 %vm354_vm1, %v342_v21 }
 0x11b   : > { %v327_v24 = vpop.f32.mrf.mxu0  ;;  %616 = vmatmul.mubr.msk.bf16.vlgmr.msra.gmra.mxu1 %vm354_vm1, %v343_v22 }
 0x11d   : > { %v612_v25 = vpop.f32.mrf.mxu0 }
 0x11e   : > { %v345_v28 = vpack.c.bf16 %v612_v25, %v611_v23 }
 0x11f   : > { %v330_v26 = vpop.f32.mrf.mxu0 }
 0x120   : > { %v344_v27 = vpack.c.bf16 %v330_v26, %v327_v24 }
 0x122   : > { %619 = vmatprep.mubr.msk.bf16.mxu1 %vm354_vm1, %v344_v27 }
 0x123   : > { %620 = vmatmul.mubr.msk.bf16.gmra.mxu1 %vm354_vm1, %v345_v28 }
 0x1db   : > { %v617_v29 = vpop.f32.mrf.mxu1 }
 0x1dc   : > { %435 = vst.msk [vmem:[%s221_s24 + $0x10] sm:$0xff] %vm432_vm2, %v617_v29 }
 0x1dd   : > { %v401_v30 = vpop.f32.mrf.mxu1 }
 0x1de   : > { %433 = vst.msk [vmem:[%s221_s24] sm:$0xff] %vm432_vm2, %v401_v30 }
 0x1df   : > { %v618_v31 = vpop.f32.mrf.mxu1 }
 0x1e0   : > { %436 = vst.msk [vmem:[%s221_s24 + $0x18] sm:$0xff] %vm432_vm2, %v618_v31 }
 0x1e1   : > { %v404_v32 = vpop.f32.mrf.mxu1 }
 0x1e2   : > { %434 = vst.msk [vmem:[%s221_s24 + $0x8] sm:$0xff] %vm432_vm2, %v404_v32 }
 0x1e3   : > { %v621_v33 = vpop.f32.mrf.mxu1 }
 0x1e4   : > { %439 = vst.msk [vmem:[%s221_s24 + $0x30] sm:$0xff] %vm432_vm2, %v621_v33 }
 0x1e5   : > { %v417_v34 = vpop.f32.mrf.mxu1 }
 0x1e6   : > { %437 = vst.msk [vmem:[%s221_s24 + $0x20] sm:$0xff] %vm432_vm2, %v417_v34 }
 0x1e7   : > { %v622_v35 = vpop.f32.mrf.mxu1 }
 0x1e8   : > { %440 = vst.msk [vmem:[%s221_s24 + $0x38] sm:$0xff] %vm432_vm2, %v622_v35 }
 0x1e9   : > { %v420_v36 = vpop.f32.mrf.mxu1 }
 0x1ea   : > { %438 = vst.msk [vmem:[%s221_s24 + $0x28] sm:$0xff] %vm432_vm2, %v420_v36 }
 0x1eb   : > { %774 = shalt.err (!%p771_p5)
}
 0x1ec   : > { %s775_s18 = scalar_lea.hbm %s1026_s6, 1024  ;;  %s779_s30 = scalar_lea.hbm %s1079_s3, 2048 }
 0x1ed   : > { %p776_p7 = scmp.ne.s32.totalorder %s1026_s6, %s775_s18  ;;  %p780_p9 = scmp.lt.s32.totalorder %s1026_s6, %s1079_s3 }
 0x1ee   : > { %p781_p11 = scmp.lt.s32.totalorder %s779_s30, %s775_s18 }
 0x1ef   : > { %p777_p6 = pnand %p776_p7, %p963_p13 }
 0x1f0   : > { %p782_p10 = por %p781_p11, %p780_p9 }
 0x1f1   : > { %p778_p4 = pneg %p777_p6 }
 0x1f3   : > { %p783_p1 = pnand %p782_p10, %p778_p4 }
 0x1f5   : > { %786 = shalt.err (!%p783_p1)
}
 0x1f6   : > { %s854_s24 = smov 128   ;;  %s855_s4 = smov 8  }
 0x1f7   : > { %629 = dma.vmem_to_hbm [thread:$0]  (%p963_p13), %s1020_s29, 1024, %s1026_s6, %s442_s15, %s854_s24, %s854_s24, %s855_s4  }
 0x1f8 PF: > { %s471_s21 = sand.u32 1, %s825_s12   ;;  %p1091_p8 = scmp.ne.s32.totalorder %s1084_s23, 0 }
 0x1f9   : > { %p1092_p12 = scmp.ge.s32.totalorder %s845_s17, 2  ;;  %s472_s5 = scalar_lea.sflag [#allocation4], %s471_s21 }
 0x1fb   : > { %p640_p0 = pnand %p1092_p12, %p1091_p8 }
 0x1fd   : > { %p641_p2 = pneg %p640_p0 }
 0x1ff   : > { %820 = dma.done.wait (%p641_p2), %s472_s5, 1024  }
 0x200   : > { %822 = vsyncadd (%p641_p2), %s472_s5, 4294966272  ;;  %s20_s17 = sadd.s32 1, %s845_s17   ;;  %s1093_s12 = smov %s829_s13 }
 0x201   : > { %p17_p3 = scmp.ge.s32.totalorder %s20_s17, 4   ;;  %s1094_s13 = smov %s833_s14 }
 0x202   : > { %s1095_s14 = smov %s972_s19  ;;  %s1096_s15 = smov %s841_s16 }
 0x203   : > { %s1097_s16 = smov %s1099_s28  ;;  %19 = sbr.rel (!%p17_p3) target bundleno = 7 (0x7), region = 81 }
 0x208   :  { %477 = vsyncpa [#allocation3], 1 }
 0x209   :  { %479 = vsyncpa [#allocation3 + $0x1], 1 }
 0x20a   :  { %480 = vsyncpa [#allocation6], 1 }
 0x20b   :  { %481 = vsyncpa [#allocation4], 1 }
 0x20c   :  { %483 = vsyncpa [#allocation4 + $0x1], 1 }

</bundles_post_ra>
